<compile_context>
chip_gen: v7x
topology: tpu7x:2x2x1
jax: 0.10.0
libtpu: 0.0.40
codegen_flags: <defaults>
</compile_context>

<pallas_src>
import jax
import jax.numpy as jnp
from jax.experimental import pallas as pl
from jax.experimental.pallas import tpu as pltpu


def _gather_kernel(ids_ref, table_hbm, out_ref, copy_sem):
    """Gather one tile of embedding rows from HBM into the output block.

    ids_ref:   (N_pad,) int32, SMEM   -- all token ids (scalar-prefetched)
    table_hbm: (V, D_pad) f32, HBM    -- embedding table, never VMEM-resident
    out_ref:   (T, D_pad) f32, VMEM   -- output block for this token tile
    copy_sem:  (1,) DMA semaphore shared by the T row copies (byte-counting)
    """
    tile = out_ref.shape[0]
    base = pl.program_id(0) * tile

    # Issue T row DMAs HBM -> output VMEM block; the DMA engine runs them
    # concurrently while we keep issuing descriptors.
    @pl.loop(0, tile)
    def _issue(t):
        row = ids_ref[base + t]
        pltpu.make_async_copy(
            table_hbm.at[row], out_ref.at[t], copy_sem.at[0]
        ).start()

    # Drain: each wait consumes one row's worth of the shared byte-counting
    # semaphore; the descriptor only has to match the per-copy size/shape.
    @pl.loop(0, tile)
    def _drain(t):
        pltpu.make_async_copy(
            table_hbm.at[0], out_ref.at[0], copy_sem.at[0]
        ).wait()


def word2vec_embedding_forward(x, embedding_matrix, *, token_tile=256):
    """x: (B, S) integer token ids; embedding_matrix: (V, D) float32.

    Returns (B, S, D) float32, matching nn.Embedding(x).
    """
    B, S = x.shape
    V, D = embedding_matrix.shape
    N = B * S

    # Lane-dense output width: pad D up to a multiple of 128.
    # (In a real model the padded table would be built once at load time.)
    D_pad = ((D + 127) // 128) * 128
    table = embedding_matrix
    if D_pad != D:
        table = jnp.pad(embedding_matrix, ((0, 0), (0, D_pad - D)))

    # Flatten + clamp ids: OOB DMA has no recoverable behavior on TPU
    # (nn.Embedding would raise on OOB anyway).
    ids = jnp.clip(x.reshape(N).astype(jnp.int32), 0, V - 1)

    # Shrink the tile for tiny inputs so we don't gather mostly padding;
    # keep it a multiple of 8 (sublane constraint on the output block).
    tile = max(8, min(token_tile, ((N + 7) // 8) * 8))
    num_tiles = pl.cdiv(N, tile)
    N_pad = num_tiles * tile
    if N_pad != N:
        ids = jnp.pad(ids, (0, N_pad - N))  # pad ids point at row 0 (discarded)

    bytes_moved = 2 * N_pad * D_pad * 4 + N_pad * 4  # table reads + out writes + ids

    out_flat = pl.pallas_call(
        _gather_kernel,
        out_shape=jax.ShapeDtypeStruct((N_pad, D_pad), table.dtype),
        grid_spec=pltpu.PrefetchScalarGridSpec(
            num_scalar_prefetch=1,           # ids -> SMEM, scalar path
            grid=(num_tiles,),
            in_specs=[
                # Embedding table stays in HBM; rows are gathered by manual DMA.
                pl.BlockSpec(memory_space=pl.ANY),
            ],
            out_specs=pl.BlockSpec((tile, D_pad), lambda i, ids_ref: (i, 0)),
            scratch_shapes=[pltpu.SemaphoreType.DMA((1,))],
        ),
        compiler_params=pltpu.CompilerParams(
            dimension_semantics=("parallel",),
        ),
        cost_estimate=pl.CostEstimate(
            flops=0, transcendentals=0, bytes_accessed=bytes_moved
        ),
    )(ids, table)

    # Strip token / feature padding and restore (B, S, D).
    return out_flat[:N, :D].reshape(B, S, D)


if __name__ == "__main__":
    # Synthetic, deterministic "Word2Vec" table (the real module loads gensim
    # weights from disk; here we build the (len(tokenizer), vector_size)
    # matrix in-script).
    key = jax.random.PRNGKey(0)
    k_table, k_idx = jax.random.split(key)

    VOCAB = 64        # len(tokenizer)
    EMBED_DIM = 100   # realistic word2vec vector_size (not a multiple of 128)
    B, S = 2, 8       # small batch of token-id sequences

    embedding_matrix = jax.random.normal(
        k_table, (VOCAB, EMBED_DIM), dtype=jnp.float32
    )
    x = jax.random.randint(k_idx, (B, S), minval=0, maxval=VOCAB, dtype=jnp.int32)

    out = word2vec_embedding_forward(x, embedding_matrix)
    out = jax.block_until_ready(out)

    # Reference: plain gather (what nn.Embedding does).
    ref = jnp.take(embedding_matrix, x, axis=0)
    assert out.shape == (B, S, EMBED_DIM)
    assert jnp.allclose(out, ref, atol=1e-6), "mismatch vs reference gather"

    print("KERNEL_OK")
</pallas_src>

<mosaic_0001>
module attributes {stable_mosaic.version = 11 : i64} {
  func.func @_gather_kernel(%arg0: i32, %arg1: memref<16xi32, #tpu.memory_space<smem>>, %arg2: memref<64x128xf32, #tpu.memory_space<any>>, %arg3: memref<16x128xf32, #tpu.memory_space<vmem>>, %arg4: memref<1x!tpu.dma_semaphore, #tpu.memory_space<semaphore_mem>>) attributes {dimension_semantics = [#tpu.dimension_semantics<parallel>], iteration_bounds = array<i64: 1>, scalar_prefetch = 1 : i64, scratch_operands = 1 : i64, tpu.core_type = #tpu.core_type<tc>, window_params = [{}, {transform_indices = @transform_1, window_bounds = array<i64: 16, 128>}]} {
    %c16_i32 = arith.constant 16 : i32
    %0 = arith.muli %arg0, %c16_i32 : i32
    %c0_i32 = arith.constant 0 : i32
    %c16_i32_0 = arith.constant 16 : i32
    %1 = arith.addi %c0_i32, %c16_i32_0 : i32
    %c1_i32 = arith.constant 1 : i32
    scf.for %arg5 = %c0_i32 to %1 step %c1_i32  : i32 {
      %c1_i32_5 = arith.constant 1 : i32
      %3 = arith.muli %arg5, %c1_i32_5 : i32
      %c0_i32_6 = arith.constant 0 : i32
      %4 = arith.addi %c0_i32_6, %3 : i32
      %5 = arith.addi %0, %4 : i32
      %6 = arith.index_cast %5 : i32 to index
      %7 = memref.load %arg1[%6] : memref<16xi32, #tpu.memory_space<smem>>
      %c0_i32_7 = arith.constant 0 : i32
      %c0_i32_8 = arith.constant 0 : i32
      %8 = tpu.memref_slice %arg2[%7, %c0_i32_8] : memref<64x128xf32, #tpu.memory_space<any>> -> memref<1x128xf32, #tpu.memory_space<any>>
      %9 = tpu.memref_squeeze %8 : memref<1x128xf32, #tpu.memory_space<any>> -> memref<128xf32, #tpu.memory_space<any>>
      %c0_i32_9 = arith.constant 0 : i32
      %10 = tpu.memref_slice %arg3[%4, %c0_i32_9] : memref<16x128xf32, #tpu.memory_space<vmem>> -> memref<1x128xf32, #tpu.memory_space<vmem>>
      %11 = tpu.memref_squeeze %10 : memref<1x128xf32, #tpu.memory_space<vmem>> -> memref<128xf32, #tpu.memory_space<vmem>>
      %12 = tpu.memref_slice %arg4[%c0_i32_7] : memref<1x!tpu.dma_semaphore, #tpu.memory_space<semaphore_mem>> -> memref<1x!tpu.dma_semaphore, #tpu.memory_space<semaphore_mem>>
      %13 = tpu.memref_squeeze %12 : memref<1x!tpu.dma_semaphore, #tpu.memory_space<semaphore_mem>> -> memref<!tpu.dma_semaphore, #tpu.memory_space<semaphore_mem>>
      tpu.enqueue_dma source(%9 : memref<128xf32, #tpu.memory_space<any>>) target(%11 : memref<128xf32, #tpu.memory_space<vmem>>) target_semaphore(%13 : memref<!tpu.dma_semaphore, #tpu.memory_space<semaphore_mem>>)
    }
    %c16_i32_1 = arith.constant 16 : i32
    %c0_i32_2 = arith.constant 0 : i32
    %c16_i32_3 = arith.constant 16 : i32
    %2 = arith.addi %c0_i32_2, %c16_i32_3 : i32
    %c1_i32_4 = arith.constant 1 : i32
    scf.for %arg5 = %c0_i32_2 to %2 step %c1_i32_4  : i32 {
      %c0_i32_5 = arith.constant 0 : i32
      %c0_i32_6 = arith.constant 0 : i32
      %c0_i32_7 = arith.constant 0 : i32
      %c0_i32_8 = arith.constant 0 : i32
      %3 = tpu.memref_slice %arg2[%c0_i32_5, %c0_i32_8] : memref<64x128xf32, #tpu.memory_space<any>> -> memref<1x128xf32, #tpu.memory_space<any>>
      %4 = tpu.memref_squeeze %3 : memref<1x128xf32, #tpu.memory_space<any>> -> memref<128xf32, #tpu.memory_space<any>>
      %c0_i32_9 = arith.constant 0 : i32
      %5 = tpu.memref_slice %arg3[%c0_i32_6, %c0_i32_9] : memref<16x128xf32, #tpu.memory_space<vmem>> -> memref<1x128xf32, #tpu.memory_space<vmem>>
      %6 = tpu.memref_squeeze %5 : memref<1x128xf32, #tpu.memory_space<vmem>> -> memref<128xf32, #tpu.memory_space<vmem>>
      %7 = tpu.memref_slice %arg4[%c0_i32_7] : memref<1x!tpu.dma_semaphore, #tpu.memory_space<semaphore_mem>> -> memref<1x!tpu.dma_semaphore, #tpu.memory_space<semaphore_mem>>
      %8 = tpu.memref_squeeze %7 : memref<1x!tpu.dma_semaphore, #tpu.memory_space<semaphore_mem>> -> memref<!tpu.dma_semaphore, #tpu.memory_space<semaphore_mem>>
      tpu.wait_dma2 semaphore(%8 : memref<!tpu.dma_semaphore, #tpu.memory_space<semaphore_mem>>) src(%4 : memref<128xf32, #tpu.memory_space<any>>) dst(%6 : memref<128xf32, #tpu.memory_space<vmem>>)
    }
    return
  }
  func.func @transform_1(%arg0: i32, %arg1: memref<16xi32, #tpu.memory_space<smem>>) -> (i32, i32) {
    %c0_i32 = arith.constant 0 : i32
    %c0_i32_0 = arith.constant 0 : i32
    return %arg0, %c0_i32 : i32, i32
  }
}

</mosaic_0001>

<bundles_post_ra>
// kernel: tpu_custom_call.1
= control target key start
LH: loop header
LB: loop body
LE: loop exit
PB: predicated region body
PF: predicated region fallthrough
CT: control target
= control target key end

     0   :  { %s248_s0 = inlined_call_operand.hbm [shape: s32[16], index: 0, kind: input, shape index: {}]   ;;  %s249_s1 = inlined_call_operand.hbm [shape: f32[64,128], index: 1, kind: input, shape index: {}]   ;;  %s250_s2 = inlined_call_operand.hbm [shape: f32[16,128], index: 2, kind: output, shape index: {}]  }
   0x1   :  { %s100_s11 = scalar_lea.hbm %s248_s0, 16 }
   0x2   :  { %p101_p0 = scmp.ne.s32.totalorder %s248_s0, %s100_s11  ;;  %p104_p1 = scmp.lt.u32.totalorder %s100_s11, %s248_s0 }
   0x4   :  { %p106_p2 = pnand %p104_p1, %p101_p0 }
   0x6   :  { %109 = shalt.err (!%p106_p2)  }
   0x7   :  { %s178_s16 = smov [#allocation4]  }
   0x8   :  { %8 = dma.hbm_to_smem %s248_s0, 16, %s178_s16, [#allocation3] }
   0x9   :  { %164 = dma.done.wait [#allocation3], 16 }
   0xa   :  { %165 = vsyncadd [#allocation3], 4294967280 }
   0xb   :  { %10 = sfence }
   0xc   :  { %11 = vsyncpa [#allocation6], 0  ;;  %s209_s19 = smov 0  }
   0xd LB: > { %s20_s20 = sld [smem:[#allocation4 + %s172_s19]]  ;;  %s23_s21 = scalar_lea.vmem [#allocation5], %s172_s19  ;;  %s172_s19 = sphi %s209_s19, %s18_s19  }
   0xe   : > { %s31_s22 = sshll.u32 %s23_s21, 4  ;;  %s112_s29 = scalar_lea.hbm %s249_s1, 1024  ;;  %s32_s22 = int_to_ptr.vmem [resolvable:$true] %s31_s22 }
  0x13   : > { %s78_s23 = sshll.u32 %s20_s20, 4 }
  0x14   : > { %s22_s25 = scalar_lea.hbm %s249_s1, %s78_s23 }
  0x15   : > { %s110_s26 = scalar_lea.hbm %s22_s25, 16  ;;  %p113_p4 = scmp.lt.u32.totalorder %s22_s25, %s249_s1 }
  0x16   : > { %p111_p3 = scmp.ne.s32.totalorder %s22_s25, %s110_s26  ;;  %p114_p5 = scmp.lt.u32.totalorder %s112_s29, %s110_s26 }
  0x17   : > { %p116_p7 = scmp.lt.u32.totalorder %s110_s26, %s22_s25 }
  0x18   : > { %p115_p6 = por %p114_p5, %p113_p4 }
  0x1a   : > { %p117_p8 = por %p116_p7, %p115_p6 }
  0x1c   : > { %p118_p9 = pnand %p117_p8, %p111_p3 }
  0x1e   : > { %121 = shalt.err (!%p118_p9)  }
  0x1f   : > { %s122_s4 = scalar_lea.vmem %s32_s22, 16  ;;  %s179_s5 = smov [#allocation5]  }
  0x20   : > { %p123_p10 = scmp.ne.s32.totalorder %s32_s22, %s122_s4  ;;  %s124_s6 = sshll.u32 %s179_s5, 4  ;;  %s225_s6 = int_to_ptr.vmem [resolvable:$false] %s124_s6 }
  0x21   : > { %s126_s7 = scalar_lea.vmem %s225_s6, 256  ;;  %p127_p11 = scmp.lt.s32.totalorder %s32_s22, %s225_s6 }
  0x22   : > { %p128_p12 = scmp.lt.s32.totalorder %s126_s7, %s122_s4 }
  0x24   : > { %p129_p13 = por %p128_p12, %p127_p11 }
  0x26   : > { %p130_p0 = pnand %p129_p13, %p123_p10 }
  0x28   : > { %133 = shalt.err (!%p130_p0)  }
  0x29   : > { %34 = dma.hbm_to_vmem [thread:$0]  %s22_s25, 16, %s32_s22, [#allocation2] }
  0x2a   : > { %s18_s19 = sadd.s32 1, %s172_s19  }
  0x2b   : > { %p15_p1 = scmp.ge.s32.totalorder %s18_s19, 16  }
  0x2c   :  { %s174_s8 = smov (%p15_p1), 0  }
  0x2d   :  { %17 = sbr.rel (!%p15_p1) target bundleno = 13 (0xd), region = 40 }
  0x34 LB: > { %166 = dma.done.wait [#allocation2], 16  ;;  %s176_s8 = sphi %s174_s8, %s40_s8  }
  0x35   : > { %167 = vsyncadd [#allocation2], 4294967280  ;;  %s40_s8 = sadd.s32 1, %s176_s8  }
  0x36   : > { %p37_p2 = scmp.ge.s32.totalorder %s40_s8, 16  }
  0x37   :  { %p135_p3 = scmp.ne.s32.totalorder (%p37_p2), %s225_s6, %s126_s7  ;;  %p139_p4 = scmp.lt.s32.totalorder (%p37_p2), %s225_s6, %s225_s6 }
  0x38   :  { %39 = sbr.rel (!%p37_p2) target bundleno = 52 (0x34), region = 51  ;;  %p140_p5 = scmp.lt.s32.totalorder (%p37_p2), %s126_s7, %s126_s7 }
  0x3a   :  { %p141_p6 = por (%p37_p2), %p140_p5, %p139_p4 }
  0x3c   :  { %p142_p7 = pnand (%p37_p2), %p141_p6, %p135_p3 }
  0x3f   :  { %145 = shalt.err (!%p142_p7)
}
  0x40   :  { %s146_s10 = scalar_lea.hbm %s250_s2, 256 }
  0x41   :  { %p147_p8 = scmp.ne.s32.totalorder %s250_s2, %s146_s10  ;;  %p150_p9 = scmp.lt.u32.totalorder %s146_s10, %s250_s2 }
  0x43   :  { %p152_p10 = pnand %p150_p9, %p147_p8 }
  0x45   :  { %155 = shalt.err (!%p152_p10)
}
  0x46   :  { %s180_s15 = smov 128   ;;  %s181_s16 = smov 8  }
  0x47   :  { %54 = dma.vmem_to_hbm [thread:$0]  %s225_s6, 256, %s250_s2, [#allocation6], %s180_s15, %s180_s15, %s181_s16  }
  0x48   :  { %168 = dma.done.wait [#allocation6], 256  }
  0x49   :  { %169 = vsyncadd [#allocation6], 4294967040 }
  0x4a   :  { %58 = vsyncpa [#allocation6], 1 }
  0x4b   :  { %59 = vsyncmov [#allocation2] }
  0x4e   :  { %s60_s19 = vpop.sfrf %59 }
  0x4f   :  { %p79_p11 = scmp.ne.s32.totalorder %s60_s19, 0 }
  0x51   :  { %64 = shalt.err (%p79_p11)  }

</bundles_post_ra>
